<compile_context>
chip_gen: v6e
topology: v6e:2x2x1
jax: 0.10.0
libtpu: 0.0.40
codegen_flags: <defaults>
</compile_context>

<pallas_src>
import functools

import jax
import jax.numpy as jnp
from jax.experimental import pallas as pl
from jax.experimental.pallas import tpu as pltpu


def _critic_kernel(n_states, x_ref, w1_ref, b1_ref, w2s_ref, w2a_ref, b2_ref,
                   w3_ref, b3_ref, o_ref):
    x = x_ref[...]                            # (TILE_B, n_states + n_actions)
    s = x[:, :n_states]                       # (TILE_B, n_states)
    a = x[:, n_states:]                       # (TILE_B, n_actions)

    # Layer 1: Linear(n_states, hidden1) + ReLU
    h1 = jnp.dot(s, w1_ref[...], preferred_element_type=jnp.float32) + b1_ref[...]
    h1 = jnp.maximum(h1, 0.0)                 # (TILE_B, hidden1)

    # Layer 2: Linear(hidden1 + n_actions, hidden2) on cat([h1, a]) + ReLU,
    # decomposed as a split matmul (no in-kernel concatenate).
    z2 = jnp.dot(h1, w2s_ref[...], preferred_element_type=jnp.float32)
    if a.shape[-1] == 1:
        # Outer product == broadcast multiply on the VPU; skip a K=1 MXU push.
        z2 = z2 + a * w2a_ref[...]
    else:
        z2 = z2 + jnp.dot(a, w2a_ref[...], preferred_element_type=jnp.float32)
    h2 = jnp.maximum(z2 + b2_ref[...], 0.0)   # (TILE_B, hidden2)

    # Layer 3: Linear(hidden2, 1) as VPU multiply + lane reduction
    # (w3 stored as a (1, hidden2) row) — avoids an N=1 MXU matmul.
    o_ref[...] = jnp.sum(h2 * w3_ref[...], axis=-1, keepdims=True) + b3_ref[...]


def critic_forward(states, actions, params, *, tile_b=None):
    w1, b1, w2s, w2a, b2, w3_row, b3 = params
    B, n_states = states.shape
    n_actions = actions.shape[-1]

    # One merged, lane-padded input stream per tile instead of two.
    x = jnp.concatenate([states, actions], axis=-1).astype(jnp.float32)
    n_feat = n_states + n_actions

    # Batch tile selection: 256/512-row multiples feed the MXU M-dim on
    # v6e/v7x; tiny batches get a single sublane-aligned tile. Capped so the
    # lane-padded, double-buffered tiles fit scoped VMEM on every generation.
    if tile_b is None:
        if B >= 1024:
            tile_b = 512
        elif B >= 256:
            tile_b = 256
        else:
            tile_b = -(-B // 8) * 8           # round up to a sublane multiple
    tile_b = min(tile_b, 4096)

    num_tiles = pl.cdiv(B, tile_b)
    B_pad = num_tiles * tile_b
    if B_pad != B:
        x = jnp.pad(x, ((0, B_pad - B), (0, 0)))

    weights = (w1, b1, w2s, w2a, b2, w3_row, b3)

    def resident(arr):
        # Constant index_map: block stays resident in VMEM across the grid.
        nd = arr.ndim
        return pl.BlockSpec(arr.shape, lambda i, _nd=nd: (0,) * _nd)

    out = pl.pallas_call(
        functools.partial(_critic_kernel, n_states),
        out_shape=jax.ShapeDtypeStruct((B_pad, 1), jnp.float32),
        grid=(num_tiles,),
        in_specs=[pl.BlockSpec((tile_b, n_feat), lambda i: (i, 0))]
                 + [resident(w) for w in weights],
        out_specs=pl.BlockSpec((tile_b, 1), lambda i: (i, 0)),
        compiler_params=pltpu.CompilerParams(
            dimension_semantics=("parallel",),        # megacore split on v7x
            vmem_limit_bytes=32 * 1024 * 1024,
        ),
    )(x, *weights)
    return out[:B]


def xavier_uniform(key, fan_in, fan_out):
    # Matches nn.init.xavier_uniform_ on a (out, in) Linear weight; stored as (in, out).
    limit = jnp.sqrt(6.0 / (fan_in + fan_out))
    return jax.random.uniform(key, (fan_in, fan_out), jnp.float32, -limit, limit)


def init_critic_params(key, n_states=5, n_actions=1, hidden1=50, hidden2=20):
    k1, k2, k3 = jax.random.split(key, 3)
    w1 = xavier_uniform(k1, n_states, hidden1)                 # (5, 50)
    b1 = jnp.zeros((1, hidden1), jnp.float32)
    w2 = xavier_uniform(k2, hidden1 + n_actions, hidden2)      # (51, 20)
    w2s, w2a = w2[:hidden1], w2[hidden1:]                      # (50, 20), (1, 20)
    b2 = jnp.zeros((1, hidden2), jnp.float32)
    w3_row = xavier_uniform(k3, hidden2, 1).T                  # (1, 20)
    b3 = jnp.zeros((1, 1), jnp.float32)
    return (w1, b1, w2s, w2a, b2, w3_row, b3)


def critic_reference(states, actions, params):
    w1, b1, w2s, w2a, b2, w3_row, b3 = params
    h1 = jnp.maximum(states @ w1 + b1, 0.0)
    x2 = jnp.concatenate([h1, actions], axis=-1)
    w2 = jnp.concatenate([w2s, w2a], axis=0)
    h2 = jnp.maximum(x2 @ w2 + b2, 0.0)
    return h2 @ w3_row.T + b3


if __name__ == "__main__":
    n_states, n_actions, hidden1, hidden2 = 5, 1, 50, 20

    key = jax.random.PRNGKey(0)
    k_params, k_s, k_a = jax.random.split(key, 3)
    params = init_critic_params(k_params, n_states, n_actions, hidden1, hidden2)

    # Small batch (single sublane-aligned tile).
    batch = 8
    states = jax.random.normal(k_s, (batch, n_states), jnp.float32)
    actions = jax.random.normal(k_a, (batch, n_actions), jnp.float32)
    out = jax.block_until_ready(critic_forward(states, actions, params))
    ref = critic_reference(states, actions, params)
    assert out.shape == (batch, 1)
    assert jnp.allclose(out, ref, atol=1e-5, rtol=1e-5), "mismatch vs reference (batch=8)"

    # Larger batch exercises batch tiling + padding (2 tiles of 256, padded rows sliced off).
    batch2 = 260
    s2 = jax.random.normal(jax.random.PRNGKey(1), (batch2, n_states), jnp.float32)
    a2 = jax.random.normal(jax.random.PRNGKey(2), (batch2, n_actions), jnp.float32)
    out2 = jax.block_until_ready(critic_forward(s2, a2, params))
    ref2 = critic_reference(s2, a2, params)
    assert out2.shape == (batch2, 1)
    assert jnp.allclose(out2, ref2, atol=1e-5, rtol=1e-5), "mismatch vs reference (batch=260)"

    print("KERNEL_OK")
</pallas_src>

<mosaic_0001>
module attributes {stable_mosaic.version = 11 : i64} {
  func.func @_critic_kernel(%arg0: i32, %arg1: memref<8x6xf32, #tpu.memory_space<vmem>>, %arg2: memref<5x50xf32, #tpu.memory_space<vmem>>, %arg3: memref<1x50xf32, #tpu.memory_space<vmem>>, %arg4: memref<50x20xf32, #tpu.memory_space<vmem>>, %arg5: memref<1x20xf32, #tpu.memory_space<vmem>>, %arg6: memref<1x20xf32, #tpu.memory_space<vmem>>, %arg7: memref<1x20xf32, #tpu.memory_space<vmem>>, %arg8: memref<1x1xf32, #tpu.memory_space<vmem>>, %arg9: memref<8x1xf32, #tpu.memory_space<vmem>>) attributes {dimension_semantics = [#tpu.dimension_semantics<parallel>], iteration_bounds = array<i64: 1>, scalar_prefetch = 0 : i64, scratch_operands = 0 : i64, tpu.core_type = #tpu.core_type<tc>, window_params = [{transform_indices = @transform_0, window_bounds = array<i64: 8, 6>}, {pipeline_mode = #tpu.pipeline_mode<synchronous>, transform_indices = @transform_1, window_bounds = array<i64: 5, 50>}, {pipeline_mode = #tpu.pipeline_mode<synchronous>, transform_indices = @transform_2, window_bounds = array<i64: 1, 50>}, {pipeline_mode = #tpu.pipeline_mode<synchronous>, transform_indices = @transform_3, window_bounds = array<i64: 50, 20>}, {pipeline_mode = #tpu.pipeline_mode<synchronous>, transform_indices = @transform_4, window_bounds = array<i64: 1, 20>}, {pipeline_mode = #tpu.pipeline_mode<synchronous>, transform_indices = @transform_5, window_bounds = array<i64: 1, 20>}, {pipeline_mode = #tpu.pipeline_mode<synchronous>, transform_indices = @transform_6, window_bounds = array<i64: 1, 20>}, {pipeline_mode = #tpu.pipeline_mode<synchronous>, transform_indices = @transform_7, window_bounds = array<i64: 1, 1>}, {transform_indices = @transform_8, window_bounds = array<i64: 8, 1>}]} {
    %c0 = arith.constant 0 : index
    %c0_0 = arith.constant 0 : index
    %0 = vector.load %arg1[%c0, %c0_0] : memref<8x6xf32, #tpu.memory_space<vmem>>, vector<8x6xf32>
    %1 = vector.extract_strided_slice %0 {offsets = [0, 0], sizes = [8, 5], strides = [1, 1]} : vector<8x6xf32> to vector<8x5xf32>
    %2 = vector.extract_strided_slice %0 {offsets = [0, 5], sizes = [8, 1], strides = [1, 1]} : vector<8x6xf32> to vector<8x1xf32>
    %c0_1 = arith.constant 0 : index
    %c0_2 = arith.constant 0 : index
    %3 = vector.load %arg2[%c0_1, %c0_2] : memref<5x50xf32, #tpu.memory_space<vmem>>, vector<5x50xf32>
    %cst = arith.constant dense<0.000000e+00> : vector<8x50xf32>
    %4 = tpu.matmul %1, %3, %cst {dimension_numbers = #tpu.dot_dimension_numbers<[1], [0], [0], [1], [0, 0, 1, 1], [], []>} : vector<8x5xf32>, vector<5x50xf32>, vector<8x50xf32> -> vector<8x50xf32>
    %c0_3 = arith.constant 0 : index
    %c0_4 = arith.constant 0 : index
    %5 = vector.load %arg3[%c0_3, %c0_4] : memref<1x50xf32, #tpu.memory_space<vmem>>, vector<1x50xf32>
    %6 = vector.broadcast %5 : vector<1x50xf32> to vector<8x50xf32>
    %7 = arith.addf %4, %6 : vector<8x50xf32>
    %cst_5 = arith.constant 0.000000e+00 : f32
    %8 = vector.broadcast %cst_5 : f32 to vector<8x50xf32>
    %9 = arith.maximumf %7, %8 : vector<8x50xf32>
    %c0_6 = arith.constant 0 : index
    %c0_7 = arith.constant 0 : index
    %10 = vector.load %arg4[%c0_6, %c0_7] : memref<50x20xf32, #tpu.memory_space<vmem>>, vector<50x20xf32>
    %cst_8 = arith.constant dense<0.000000e+00> : vector<8x20xf32>
    %11 = tpu.matmul %9, %10, %cst_8 {dimension_numbers = #tpu.dot_dimension_numbers<[1], [0], [0], [1], [0, 0, 1, 1], [], []>} : vector<8x50xf32>, vector<50x20xf32>, vector<8x20xf32> -> vector<8x20xf32>
    %c0_9 = arith.constant 0 : index
    %c0_10 = arith.constant 0 : index
    %12 = vector.load %arg5[%c0_9, %c0_10] : memref<1x20xf32, #tpu.memory_space<vmem>>, vector<1x20xf32>
    %13 = vector.broadcast %2 : vector<8x1xf32> to vector<8x20xf32>
    %14 = vector.broadcast %12 : vector<1x20xf32> to vector<8x20xf32>
    %15 = arith.mulf %13, %14 : vector<8x20xf32>
    %16 = arith.addf %11, %15 : vector<8x20xf32>
    %c0_11 = arith.constant 0 : index
    %c0_12 = arith.constant 0 : index
    %17 = vector.load %arg6[%c0_11, %c0_12] : memref<1x20xf32, #tpu.memory_space<vmem>>, vector<1x20xf32>
    %18 = vector.broadcast %17 : vector<1x20xf32> to vector<8x20xf32>
    %19 = arith.addf %16, %18 : vector<8x20xf32>
    %cst_13 = arith.constant 0.000000e+00 : f32
    %20 = vector.broadcast %cst_13 : f32 to vector<8x20xf32>
    %21 = arith.maximumf %19, %20 : vector<8x20xf32>
    %c0_14 = arith.constant 0 : index
    %c0_15 = arith.constant 0 : index
    %22 = vector.load %arg7[%c0_14, %c0_15] : memref<1x20xf32, #tpu.memory_space<vmem>>, vector<1x20xf32>
    %23 = vector.broadcast %22 : vector<1x20xf32> to vector<8x20xf32>
    %24 = arith.mulf %21, %23 : vector<8x20xf32>
    %cst_16 = arith.constant dense<0.000000e+00> : vector<8xf32>
    %25 = vector.multi_reduction <add>, %24, %cst_16 [1] : vector<8x20xf32> to vector<8xf32>
    %26 = vector.shape_cast %25 : vector<8xf32> to vector<8x1xf32>
    %c0_17 = arith.constant 0 : index
    %c0_18 = arith.constant 0 : index
    %27 = vector.load %arg8[%c0_17, %c0_18] : memref<1x1xf32, #tpu.memory_space<vmem>>, vector<1x1xf32>
    %28 = vector.broadcast %27 : vector<1x1xf32> to vector<8x1xf32>
    %29 = arith.addf %26, %28 : vector<8x1xf32>
    %c0_19 = arith.constant 0 : index
    %c0_20 = arith.constant 0 : index
    %30 = vector.load %arg9[%c0_19, %c0_20] : memref<8x1xf32, #tpu.memory_space<vmem>>, vector<8x1xf32>
    tpu.vector_store %arg9[%c0_19, %c0_20], %29 {strides = array<i32>} : memref<8x1xf32, #tpu.memory_space<vmem>>, vector<8x1xf32>,
    return
  }
  func.func @transform_0(%arg0: i32) -> (i32, i32) {
    %c0_i32 = arith.constant 0 : i32
    %c0_i32_0 = arith.constant 0 : i32
    return %arg0, %c0_i32 : i32, i32
  }
  func.func @transform_1(%arg0: i32) -> (i32, i32) {
    %c0_i32 = arith.constant 0 : i32
    %c0_i32_0 = arith.constant 0 : i32
    %c0_i32_1 = arith.constant 0 : i32
    return %c0_i32, %c0_i32_0 : i32, i32
  }
  func.func @transform_2(%arg0: i32) -> (i32, i32) {
    %c0_i32 = arith.constant 0 : i32
    %c0_i32_0 = arith.constant 0 : i32
    %c0_i32_1 = arith.constant 0 : i32
    return %c0_i32, %c0_i32_0 : i32, i32
  }
  func.func @transform_3(%arg0: i32) -> (i32, i32) {
    %c0_i32 = arith.constant 0 : i32
    %c0_i32_0 = arith.constant 0 : i32
    %c0_i32_1 = arith.constant 0 : i32
    return %c0_i32, %c0_i32_0 : i32, i32
  }
  func.func @transform_4(%arg0: i32) -> (i32, i32) {
    %c0_i32 = arith.constant 0 : i32
    %c0_i32_0 = arith.constant 0 : i32
    %c0_i32_1 = arith.constant 0 : i32
    return %c0_i32, %c0_i32_0 : i32, i32
  }
  func.func @transform_5(%arg0: i32) -> (i32, i32) {
    %c0_i32 = arith.constant 0 : i32
    %c0_i32_0 = arith.constant 0 : i32
    %c0_i32_1 = arith.constant 0 : i32
    return %c0_i32, %c0_i32_0 : i32, i32
  }
  func.func @transform_6(%arg0: i32) -> (i32, i32) {
    %c0_i32 = arith.constant 0 : i32
    %c0_i32_0 = arith.constant 0 : i32
    %c0_i32_1 = arith.constant 0 : i32
    return %c0_i32, %c0_i32_0 : i32, i32
  }
  func.func @transform_7(%arg0: i32) -> (i32, i32) {
    %c0_i32 = arith.constant 0 : i32
    %c0_i32_0 = arith.constant 0 : i32
    %c0_i32_1 = arith.constant 0 : i32
    return %c0_i32, %c0_i32_0 : i32, i32
  }
  func.func @transform_8(%arg0: i32) -> (i32, i32) {
    %c0_i32 = arith.constant 0 : i32
    %c0_i32_0 = arith.constant 0 : i32
    return %arg0, %c0_i32 : i32, i32
  }
}

</mosaic_0001>

<bundles_post_ra>
// kernel: tpu_custom_call.1
= control target key start
LH: loop header
LB: loop body
LE: loop exit
PB: predicated region body
PF: predicated region fallthrough
CT: control target
= control target key end

     0   :  { %vm44_vm0 = vcmask 1044480   ;;  %vm40_vm1 = vcmask 39936   ;;  %v296_v0 = vmov 0.0   ;;  %vm297_vm2 = vmmov 0   ;;  %s389_s1 = inlined_call_operand.vmem [shape: f32[5,50], index: 1, kind: input, shape index: {}]   ;;  %s390_s0 = inlined_call_operand.vmem [shape: f32[8,6], index: 0, kind: input, shape index: {}]   ;;  %s391_s3 = inlined_call_operand.vmem [shape: f32[50,20], index: 3, kind: input, shape index: {}]   ;;  %s392_s2 = inlined_call_operand.vmem [shape: f32[1,50], index: 2, kind: input, shape index: {}]   ;;  %s393_s7 = inlined_call_operand.<no memory space> [shape: f32[1,1], index: 7, kind: input, shape index: {}]   ;;  %s394_s4 = inlined_call_operand.vmem [shape: f32[1,20], index: 4, kind: input, shape index: {}]   ;;  %s395_s5 = inlined_call_operand.vmem [shape: f32[1,20], index: 5, kind: input, shape index: {}]   ;;  %s396_s6 = inlined_call_operand.vmem [shape: f32[1,20], index: 6, kind: input, shape index: {}]   ;;  %s397_s8 = inlined_call_operand.vmem [shape: f32[8,1], index: 8, kind: output, shape index: {}]  }
   0x1   :  { %270 = vmatprep.subr.mxu0 %v296_v0  ;;  %v32_v1 = vld [vmem:[%s389_s1] sm:$0x1f]  ;;  %272 = vmatprep.mubr.msk.f32.mxu0 %vm297_vm2, %v296_v0  ;;  %v125_v3 = vld [vmem:[%s391_s3 + $0x30] sm:$0x3]  ;;  %vm142_vm3 = vcmask 1041408   ;;  %v124_v4 = vld [vmem:[%s391_s3 + $0x28] sm:$0xff]  ;;  %v13_v16 = vstv %s393_s7 }
   0x2   :  { %v31_v2 = vld [vmem:[%s390_s0] sm:$0xff]  ;;  %271 = vmatpush3.msk.msra.mxu0 %vm44_vm0, %v32_v1  ;;  %275 = vmatprep.subr.mxu1 %v296_v0  ;;  %v122_v6 = vld [vmem:[%s391_s3 + $0x18] sm:$0xff]  ;;  %v121_v7 = vld [vmem:[%s391_s3 + $0x10] sm:$0xff]  ;;  %v298_v10 = vmov 5   ;;  %vm138_vm4 = vcmask 408576   ;;  %vm233_vm5 = vcmask 162816  }
   0x3   :  { %273 = vmatmul.mubr.msk.f32.vlgmr.msra.gmra.mxu0 %vm40_vm1, %v31_v2  ;;  %276 = vmatpush3.msk.msra.mxu1 %vm142_vm3, %v125_v3  ;;  %v123_v5 = vld [vmem:[%s391_s3 + $0x20] sm:$0xff]  ;;  %v120_v8 = vld [vmem:[%s391_s3 + $0x8] sm:$0xff]  ;;  %14 = vst [vmem:[#allocation2] sm:$0x1] %v13_v16  ;;  %vm245_vm6 = vcmask 7168  }
   0x4   :  { %277 = vmatprep.subr.mxu1 %v296_v0  ;;  %289 = vmatprep.mubr.msk.f32.mxu1 %vm297_vm2, %v296_v0  ;;  %v119_v9 = vld [vmem:[%s391_s3] sm:$0xff] }
   0x5   :  { %278 = vmatpush3.msra.mxu1 %v124_v4  ;;  %295 = vset.pattern.permute.xlu0 %v298_v10  ;;  %v251_v11 = vld [vmem:[%s392_s2] ss:$0 sm:$0xff] }
   0x6   :  { %279 = vmatprep.subr.mxu1 %v296_v0  ;;  %128 = vperm.xlu0 %295, %v31_v2   ;;  %v254_v17 = vld [vmem:[%s394_s4] ss:$0 sm:$0xff] }
   0x7   :  { %280 = vmatpush3.msra.mxu1 %v123_v5  ;;  %v257_v21 = vld [vmem:[%s395_s5] ss:$0 sm:$0xff] }
   0x8   :  { %281 = vmatprep.subr.mxu1 %v296_v0  ;;  %v258_v25 = vld [vmem:[%s396_s6] ss:$0 sm:$0xff] }
   0x9   :  { %282 = vmatpush3.msra.mxu1 %v122_v6 }
   0xa   :  { %283 = vmatprep.subr.mxu1 %v296_v0  ;;  %v259_v29 = vld [vmem:[#allocation2] ss:$0 sm:$0xff] }
   0xb   :  { %284 = vmatpush3.msra.mxu1 %v121_v7 }
   0xc   :  { %285 = vmatprep.subr.mxu1 %v296_v0 }
   0xd   :  { %286 = vmatpush3.msra.mxu1 %v120_v8 }
   0xe   :  { %287 = vmatprep.subr.mxu1 %v296_v0 }
   0xf   :  { %288 = vmatpush3.msra.mxu1 %v119_v9 }
  0x81   :  { %v129_v18 = vpop.permute.xlu0 %128 }
  0x82   :  { %v137_v19 = vmul.f32 %v254_v17, %v129_v18 }
  0xc3   :  { %v114_v12 = vpop.f32.mrf.mxu0 }
  0xc4   :  { %v115_v13 = vadd.f32 %v251_v11, %v114_v12 }
  0xc5   :  { %v274_v14 = vpop.f32.mrf.mxu0 }
  0xc6   :  { %v118_v15 = vmax.f32 %v115_v13, 0.0 }
  0xc8   :  { %290 = vmatmul.mubr.msk.f32.vlgmr.msra.gmra.mxu1 %vm138_vm4, %v118_v15 }
 0x188   :  { %v212_v20 = vpop.f32.mrf.mxu1 }
 0x189   :  { %v213_v22 = vadd.f32 %v212_v20, %v137_v19 }
 0x18a   :  { %v291_v23 = vpop.f32.mrf.mxu1 }
 0x18b   :  { %v223_v24 = vadd.f32 %v257_v21, %v213_v22 }
 0x18d   :  { %v224_v26 = vmax.f32 %v223_v24, 0.0 }
 0x18f   :  { %v232_v27 = vmul.f32 %v258_v25, %v224_v26 }
 0x191   :  { %v234_v28 = vsel %vm233_vm5, %v232_v27, 0.0 }
 0x192   :  { %235 = vadd.xlane.f32.xlu0 %v234_v28 }
 0x21b   :  { %v236_v30 = vpop.xlane.xlu0 %235 }
 0x21c   :  { %v244_v31 = vadd.f32 %v259_v29, %v236_v30 }
 0x21e   :  { %246 = vst.msk [vmem:[%s397_s8] sm:$0xff] %vm245_vm6, %v244_v31 }

</bundles_post_ra>
